<compile_context>
chip_gen: v6e
topology: v6e:2x2x1
jax: 0.10.0
libtpu: 0.0.40
codegen_flags: <defaults>
</compile_context>

<pallas_src>
import functools
import math

import jax
import jax.numpy as jnp
from jax.experimental import pallas as pl
from jax.experimental.pallas import tpu as pltpu

LANE = 128
SUBLANE_BF16 = 16          # bf16 packs two rows per sublane -> 16-row granules
FUSED_MAX_NP = 2048        # adj bf16 (possibly double-buffered) + f32 temps fit VMEM
VMEM_LIMIT = 64 * 1024 * 1024   # explicit scoped-VMEM cap (safe on v5e/v6e/v7x)


def _round_up(x, m):
    return ((x + m - 1) // m) * m


# ---------------------------------------------------------------------------
# Fused path: both layers in one pallas_call, adj resident in VMEM.
# ---------------------------------------------------------------------------
def gcn_fused_kernel(x_ref, adj_ref, w1_ref, b1_ref, w2_ref, b2_ref, out_ref):
    adj = adj_ref[...]
    # Layer 1: h1 = relu(adj @ (X @ W1) + b1)
    s1 = jnp.dot(x_ref[...], w1_ref[...], preferred_element_type=jnp.float32)
    h1 = jnp.dot(adj, s1.astype(jnp.bfloat16),
                 preferred_element_type=jnp.float32)
    h1 = jnp.maximum(h1 + b1_ref[...], 0.0).astype(jnp.bfloat16)
    # Dropout is identity at inference.
    # Layer 2: out = adj @ (h1 @ W2) + b2
    s2 = jnp.dot(h1, w2_ref[...], preferred_element_type=jnp.float32)
    out = jnp.dot(adj, s2.astype(jnp.bfloat16),
                  preferred_element_type=jnp.float32)
    out_ref[...] = (out + b2_ref[...]).astype(out_ref.dtype)


def gcn_fused(feat_p, adj_p, w1_p, b1_p, w2_p, b2_p):
    n_p, nfeat = feat_p.shape
    nhid1_p = w1_p.shape[1]
    nhid2_p = w2_p.shape[1]
    return pl.pallas_call(
        gcn_fused_kernel,
        out_shape=jax.ShapeDtypeStruct((n_p, nhid2_p), jnp.float32),
        grid=(1,),
        in_specs=[
            pl.BlockSpec((n_p, nfeat), lambda i: (0, 0)),       # X
            pl.BlockSpec((n_p, n_p), lambda i: (0, 0)),         # adj (resident)
            pl.BlockSpec((nfeat, nhid1_p), lambda i: (0, 0)),   # W1
            pl.BlockSpec((1, nhid1_p), lambda i: (0, 0)),       # b1
            pl.BlockSpec((nhid1_p, nhid2_p), lambda i: (0, 0)), # W2
            pl.BlockSpec((1, nhid2_p), lambda i: (0, 0)),       # b2
        ],
        out_specs=pl.BlockSpec((n_p, nhid2_p), lambda i: (0, 0)),
        compiler_params=pltpu.CompilerParams(
            dimension_semantics=("arbitrary",),
            vmem_limit_bytes=VMEM_LIMIT),
    )(feat_p, adj_p, w1_p, b1_p, w2_p, b2_p)


# ---------------------------------------------------------------------------
# Streaming path for large graphs: hoisted support, row-tiled + K-blocked adj.
# ---------------------------------------------------------------------------
def support_kernel(x_ref, w_ref, o_ref):
    o_ref[...] = jnp.dot(x_ref[...], w_ref[...],
                         preferred_element_type=jnp.float32).astype(o_ref.dtype)


def compute_support(x, w, *, tm):
    """S = X @ W, computed ONCE per layer (bf16 output), row-tiled over nodes."""
    n_p, in_dim = x.shape
    out_dim = w.shape[1]
    return pl.pallas_call(
        support_kernel,
        out_shape=jax.ShapeDtypeStruct((n_p, out_dim), jnp.bfloat16),
        grid=(n_p // tm,),
        in_specs=[
            pl.BlockSpec((tm, in_dim), lambda i: (i, 0)),
            pl.BlockSpec((in_dim, out_dim), lambda i: (0, 0)),
        ],
        out_specs=pl.BlockSpec((tm, out_dim), lambda i: (i, 0)),
        compiler_params=pltpu.CompilerParams(
            dimension_semantics=("parallel",),
            vmem_limit_bytes=VMEM_LIMIT),
    )(x, w)


def adj_matmul_kernel(adj_ref, s_ref, b_ref, out_ref, acc_ref, *, apply_relu):
    """out_tile = adj[i-tile, :] @ S + b (+relu), K-blocked over grid axis 1."""
    @pl.when(pl.program_id(1) == 0)
    def _():
        acc_ref[...] = jnp.zeros_like(acc_ref)

    acc_ref[...] += jnp.dot(adj_ref[...], s_ref[...],
                            preferred_element_type=jnp.float32)

    @pl.when(pl.program_id(1) == pl.num_programs(1) - 1)
    def _():
        h = acc_ref[...] + b_ref[...]
        if apply_relu:
            h = jnp.maximum(h, 0.0)
        out_ref[...] = h.astype(out_ref.dtype)


def adj_matmul(adj, s, b, *, apply_relu, out_dtype, tm, tk):
    """adj @ S + b: row tiles parallel (megacore), K axis arbitrary (reduction)."""
    n_p = adj.shape[0]
    out_dim = s.shape[1]
    kernel = functools.partial(adj_matmul_kernel, apply_relu=apply_relu)
    # Note: S/bias blocks with constant index along the parallel axis still get
    # default double buffers; they are tiny (tk x 128 bf16) so we skip
    # pipeline_mode tweaks and spend VMEM on large adj tiles instead.
    return pl.pallas_call(
        kernel,
        out_shape=jax.ShapeDtypeStruct((n_p, out_dim), out_dtype),
        grid=(n_p // tm, n_p // tk),
        in_specs=[
            pl.BlockSpec((tm, tk), lambda i, k: (i, k)),        # adj tile (streamed)
            pl.BlockSpec((tk, out_dim), lambda i, k: (k, 0)),   # S K-tile
            pl.BlockSpec((1, out_dim), lambda i, k: (0, 0)),    # bias
        ],
        out_specs=pl.BlockSpec((tm, out_dim), lambda i, k: (i, 0)),
        scratch_shapes=[pltpu.VMEM((tm, out_dim), jnp.float32)],
        compiler_params=pltpu.CompilerParams(
            dimension_semantics=("parallel", "arbitrary"),
            vmem_limit_bytes=VMEM_LIMIT),
    )(adj, s, b)


# ---------------------------------------------------------------------------
# Wrappers
# ---------------------------------------------------------------------------
def prepare_gcn_inputs(feature, adj, w1, b1, w2, b2, *, n_p):
    """Zero-pad to tile/lane-friendly shapes and cast matmul operands to bf16.

    Call once and reuse the results if the net is evaluated repeatedly — the
    padded bf16 adjacency is the expensive re-materialization.  Padded
    rows/cols of adj are exactly zero; layer-2 correctness relies on that
    (padded rows of h1 equal relu(b1) != 0 and must be nulled by adj's zero
    padded columns).
    """
    n, nfeat = feature.shape
    nhid1 = w1.shape[1]
    nhid2 = w2.shape[1]
    nhid1_p = _round_up(nhid1, LANE)
    nhid2_p = _round_up(nhid2, LANE)
    bf16, f32 = jnp.bfloat16, jnp.float32
    feat_p = jnp.zeros((n_p, nfeat), bf16).at[:n, :].set(feature.astype(bf16))
    adj_p = jnp.zeros((n_p, n_p), bf16).at[:n, :n].set(adj.astype(bf16))
    w1_p = jnp.zeros((nfeat, nhid1_p), bf16).at[:, :nhid1].set(w1.astype(bf16))
    b1_p = jnp.zeros((1, nhid1_p), f32).at[:, :nhid1].set(
        b1.astype(f32).reshape(1, -1))
    w2_p = jnp.zeros((nhid1_p, nhid2_p), bf16).at[:nhid1, :nhid2].set(
        w2.astype(bf16))
    b2_p = jnp.zeros((1, nhid2_p), f32).at[:, :nhid2].set(
        b2.astype(f32).reshape(1, -1))
    return feat_p, adj_p, w1_p, b1_p, w2_p, b2_p


def gcn_net(feature, adj, w1, b1, w2, b2, *, force_streaming=False,
            tm=512, tk=512):
    """Full GcnNet forward. feature [N, nfeat], adj [N, N] dense normalized."""
    n = feature.shape[0]
    nhid2 = w2.shape[1]
    n_p16 = _round_up(max(n, SUBLANE_BF16), SUBLANE_BF16)
    use_fused = (not force_streaming) and n_p16 <= FUSED_MAX_NP

    if use_fused:
        n_p = n_p16
    else:
        tm = min(tm, n_p16)
        tk = min(tk, n_p16)
        step = tm * tk // math.gcd(tm, tk)     # n_p must be divisible by both
        n_p = _round_up(n, step)

    feat_p, adj_p, w1_p, b1_p, w2_p, b2_p = prepare_gcn_inputs(
        feature, adj, w1, b1, w2, b2, n_p=n_p)

    if use_fused:
        # adj read from HBM once; both layers computed in a single kernel.
        out_p = gcn_fused(feat_p, adj_p, w1_p, b1_p, w2_p, b2_p)
    else:
        s1 = compute_support(feat_p, w1_p, tm=tm)                 # X @ W1 (once)
        h1 = adj_matmul(adj_p, s1, b1_p, apply_relu=True,
                        out_dtype=jnp.bfloat16, tm=tm, tk=tk)
        # TODO(synk): training-mode dropout (pltpu.prng_random_bits mask) not emitted.
        s2 = compute_support(h1, w2_p, tm=tm)                     # h1 @ W2 (once)
        out_p = adj_matmul(adj_p, s2, b2_p, apply_relu=False,
                           out_dtype=jnp.float32, tm=tm, tk=tk)

    # Slice off zero padding (rows beyond N, lanes beyond nhid2).
    return out_p[:n, :nhid2]


# ---------------------------------------------------------------------------
# References
# ---------------------------------------------------------------------------
def gcn_ref_f32(feature, adj, w1, b1, w2, b2):
    h1 = jnp.maximum(adj @ (feature @ w1) + b1, 0.0)
    return adj @ (h1 @ w2) + b2


def gcn_ref_bf16(feature, adj, w1, b1, w2, b2):
    """Reference with the same bf16-input / f32-accumulate scheme as the kernels."""
    bf = lambda a: a.astype(jnp.bfloat16)
    s1 = jnp.dot(bf(feature), bf(w1), preferred_element_type=jnp.float32)
    h1 = jnp.maximum(
        jnp.dot(bf(adj), bf(s1), preferred_element_type=jnp.float32) + b1, 0.0)
    h1 = bf(h1)
    s2 = jnp.dot(h1, bf(w2), preferred_element_type=jnp.float32)
    return jnp.dot(bf(adj), bf(s2), preferred_element_type=jnp.float32) + b2


if __name__ == "__main__":
    key = jax.random.PRNGKey(0)
    k_feat, k_adj, k_w1, k_b1, k_w2, k_b2 = jax.random.split(key, 6)

    # Small shapes consistent with the module: N nodes, nfeat -> nhid1 -> nhid2.
    N, nfeat, nhid1, nhid2 = 256, 16, 32, 8

    feature = jax.random.normal(k_feat, (N, nfeat), dtype=jnp.float32)

    # Deterministic symmetric normalized adjacency (with self loops).
    a = (jax.random.uniform(k_adj, (N, N)) < 0.05).astype(jnp.float32)
    a = jnp.maximum(a, a.T) + jnp.eye(N, dtype=jnp.float32)
    deg = jnp.sum(a, axis=1)
    d_inv_sqrt = 1.0 / jnp.sqrt(deg)
    adj = a * d_inv_sqrt[:, None] * d_inv_sqrt[None, :]

    # Parameters initialized like GraphConvolution.reset_parameters.
    stdv1 = 1.0 / (nhid1 ** 0.5)
    stdv2 = 1.0 / (nhid2 ** 0.5)
    w1 = jax.random.uniform(k_w1, (nfeat, nhid1), minval=-stdv1, maxval=stdv1,
                            dtype=jnp.float32)
    b1 = jax.random.uniform(k_b1, (1, nhid1), minval=-stdv1, maxval=stdv1,
                            dtype=jnp.float32)
    w2 = jax.random.uniform(k_w2, (nhid1, nhid2), minval=-stdv2, maxval=stdv2,
                            dtype=jnp.float32)
    b2 = jax.random.uniform(k_b2, (1, nhid2), minval=-stdv2, maxval=stdv2,
                            dtype=jnp.float32)

    ref_bf16 = gcn_ref_bf16(feature, adj, w1, b1, w2, b2)
    ref_f32 = gcn_ref_f32(feature, adj, w1, b1, w2, b2)

    # Fused path (default for small graphs: adj read from HBM once).
    out_fused = jax.block_until_ready(
        jax.jit(gcn_net)(feature, adj, w1, b1, w2, b2))
    assert out_fused.shape == (N, nhid2)
    assert jnp.allclose(out_fused, ref_bf16, atol=2e-3, rtol=2e-3)
    assert jnp.allclose(out_fused, ref_f32, atol=5e-2, rtol=5e-2)

    # Streaming / K-blocked path (the large-N configuration), exercised here
    # with small tiles so the multi-tile grid + accumulator epilogue is covered.
    stream_fn = jax.jit(functools.partial(
        gcn_net, force_streaming=True, tm=128, tk=128))
    out_stream = jax.block_until_ready(
        stream_fn(feature, adj, w1, b1, w2, b2))
    assert out_stream.shape == (N, nhid2)
    assert jnp.allclose(out_stream, ref_bf16, atol=2e-3, rtol=2e-3)
    assert jnp.allclose(out_stream, ref_f32, atol=5e-2, rtol=5e-2)

    print("KERNEL_OK")
</pallas_src>

<mosaic_0001>
module attributes {stable_mosaic.version = 11 : i64} {
  func.func @gcn_fused_kernel(%arg0: i32, %arg1: memref<256x16xbf16, #tpu.memory_space<vmem>>, %arg2: memref<256x256xbf16, #tpu.memory_space<vmem>>, %arg3: memref<16x128xbf16, #tpu.memory_space<vmem>>, %arg4: memref<1x128xf32, #tpu.memory_space<vmem>>, %arg5: memref<128x128xbf16, #tpu.memory_space<vmem>>, %arg6: memref<1x128xf32, #tpu.memory_space<vmem>>, %arg7: memref<256x128xf32, #tpu.memory_space<vmem>>) attributes {dimension_semantics = [#tpu.dimension_semantics<arbitrary>], iteration_bounds = array<i64: 1>, scalar_prefetch = 0 : i64, scratch_operands = 0 : i64, tpu.core_type = #tpu.core_type<tc>, window_params = [{pipeline_mode = #tpu.pipeline_mode<synchronous>, transform_indices = @transform_0, window_bounds = array<i64: 256, 16>}, {pipeline_mode = #tpu.pipeline_mode<synchronous>, transform_indices = @transform_1, window_bounds = array<i64: 256, 256>}, {pipeline_mode = #tpu.pipeline_mode<synchronous>, transform_indices = @transform_2, window_bounds = array<i64: 16, 128>}, {pipeline_mode = #tpu.pipeline_mode<synchronous>, transform_indices = @transform_3, window_bounds = array<i64: 1, 128>}, {pipeline_mode = #tpu.pipeline_mode<synchronous>, transform_indices = @transform_4, window_bounds = array<i64: 128, 128>}, {pipeline_mode = #tpu.pipeline_mode<synchronous>, transform_indices = @transform_5, window_bounds = array<i64: 1, 128>}, {pipeline_mode = #tpu.pipeline_mode<synchronous>, transform_indices = @transform_6, window_bounds = array<i64: 256, 128>}]} {
    %c0 = arith.constant 0 : index
    %c0_0 = arith.constant 0 : index
    %0 = vector.load %arg2[%c0, %c0_0] : memref<256x256xbf16, #tpu.memory_space<vmem>>, vector<256x256xbf16>
    %c0_1 = arith.constant 0 : index
    %c0_2 = arith.constant 0 : index
    %1 = vector.load %arg1[%c0_1, %c0_2] : memref<256x16xbf16, #tpu.memory_space<vmem>>, vector<256x16xbf16>
    %c0_3 = arith.constant 0 : index
    %c0_4 = arith.constant 0 : index
    %2 = vector.load %arg3[%c0_3, %c0_4] : memref<16x128xbf16, #tpu.memory_space<vmem>>, vector<16x128xbf16>
    %cst = arith.constant dense<0.000000e+00> : vector<256x128xf32>
    %3 = tpu.matmul %1, %2, %cst {dimension_numbers = #tpu.dot_dimension_numbers<[1], [0], [0], [1], [0, 0, 1, 1], [], []>} : vector<256x16xbf16>, vector<16x128xbf16>, vector<256x128xf32> -> vector<256x128xf32>
    %4 = arith.truncf %3 : vector<256x128xf32> to vector<256x128xbf16>
    %cst_5 = arith.constant dense<0.000000e+00> : vector<256x128xf32>
    %5 = tpu.matmul %0, %4, %cst_5 {dimension_numbers = #tpu.dot_dimension_numbers<[1], [0], [0], [1], [0, 0, 1, 1], [], []>} : vector<256x256xbf16>, vector<256x128xbf16>, vector<256x128xf32> -> vector<256x128xf32>
    %c0_6 = arith.constant 0 : index
    %c0_7 = arith.constant 0 : index
    %6 = vector.load %arg4[%c0_6, %c0_7] : memref<1x128xf32, #tpu.memory_space<vmem>>, vector<1x128xf32>
    %7 = vector.broadcast %6 : vector<1x128xf32> to vector<256x128xf32>
    %8 = arith.addf %5, %7 : vector<256x128xf32>
    %cst_8 = arith.constant 0.000000e+00 : f32
    %9 = vector.broadcast %cst_8 : f32 to vector<256x128xf32>
    %10 = arith.maximumf %8, %9 : vector<256x128xf32>
    %11 = arith.truncf %10 : vector<256x128xf32> to vector<256x128xbf16>
    %c0_9 = arith.constant 0 : index
    %c0_10 = arith.constant 0 : index
    %12 = vector.load %arg5[%c0_9, %c0_10] : memref<128x128xbf16, #tpu.memory_space<vmem>>, vector<128x128xbf16>
    %cst_11 = arith.constant dense<0.000000e+00> : vector<256x128xf32>
    %13 = tpu.matmul %11, %12, %cst_11 {dimension_numbers = #tpu.dot_dimension_numbers<[1], [0], [0], [1], [0, 0, 1, 1], [], []>} : vector<256x128xbf16>, vector<128x128xbf16>, vector<256x128xf32> -> vector<256x128xf32>
    %14 = arith.truncf %13 : vector<256x128xf32> to vector<256x128xbf16>
    %cst_12 = arith.constant dense<0.000000e+00> : vector<256x128xf32>
    %15 = tpu.matmul %0, %14, %cst_12 {dimension_numbers = #tpu.dot_dimension_numbers<[1], [0], [0], [1], [0, 0, 1, 1], [], []>} : vector<256x256xbf16>, vector<256x128xbf16>, vector<256x128xf32> -> vector<256x128xf32>
    %c0_13 = arith.constant 0 : index
    %c0_14 = arith.constant 0 : index
    %16 = vector.load %arg6[%c0_13, %c0_14] : memref<1x128xf32, #tpu.memory_space<vmem>>, vector<1x128xf32>
    %17 = vector.broadcast %16 : vector<1x128xf32> to vector<256x128xf32>
    %18 = arith.addf %15, %17 : vector<256x128xf32>
    %c0_15 = arith.constant 0 : index
    %c0_16 = arith.constant 0 : index
    %19 = vector.load %arg7[%c0_15, %c0_16] : memref<256x128xf32, #tpu.memory_space<vmem>>, vector<256x128xf32>
    tpu.vector_store %arg7[%c0_15, %c0_16], %18 {strides = array<i32>} : memref<256x128xf32, #tpu.memory_space<vmem>>, vector<256x128xf32>,
    return
  }
  func.func @transform_0(%arg0: i32) -> (i32, i32) {
    %c0_i32 = arith.constant 0 : i32
    %c0_i32_0 = arith.constant 0 : i32
    %c0_i32_1 = arith.constant 0 : i32
    return %c0_i32, %c0_i32_0 : i32, i32
  }
  func.func @transform_1(%arg0: i32) -> (i32, i32) {
    %c0_i32 = arith.constant 0 : i32
    %c0_i32_0 = arith.constant 0 : i32
    %c0_i32_1 = arith.constant 0 : i32
    return %c0_i32, %c0_i32_0 : i32, i32
  }
  func.func @transform_2(%arg0: i32) -> (i32, i32) {
    %c0_i32 = arith.constant 0 : i32
    %c0_i32_0 = arith.constant 0 : i32
    %c0_i32_1 = arith.constant 0 : i32
    return %c0_i32, %c0_i32_0 : i32, i32
  }
  func.func @transform_3(%arg0: i32) -> (i32, i32) {
    %c0_i32 = arith.constant 0 : i32
    %c0_i32_0 = arith.constant 0 : i32
    %c0_i32_1 = arith.constant 0 : i32
    return %c0_i32, %c0_i32_0 : i32, i32
  }
  func.func @transform_4(%arg0: i32) -> (i32, i32) {
    %c0_i32 = arith.constant 0 : i32
    %c0_i32_0 = arith.constant 0 : i32
    %c0_i32_1 = arith.constant 0 : i32
    return %c0_i32, %c0_i32_0 : i32, i32
  }
  func.func @transform_5(%arg0: i32) -> (i32, i32) {
    %c0_i32 = arith.constant 0 : i32
    %c0_i32_0 = arith.constant 0 : i32
    %c0_i32_1 = arith.constant 0 : i32
    return %c0_i32, %c0_i32_0 : i32, i32
  }
  func.func @transform_6(%arg0: i32) -> (i32, i32) {
    %c0_i32 = arith.constant 0 : i32
    %c0_i32_0 = arith.constant 0 : i32
    %c0_i32_1 = arith.constant 0 : i32
    return %c0_i32, %c0_i32_0 : i32, i32
  }
}

</mosaic_0001>

<bundles_post_ra>
// kernel: gcn_net.1
= control target key start
LH: loop header
LB: loop body
LE: loop exit
PB: predicated region body
PF: predicated region fallthrough
CT: control target
= control target key end

     0   :  { %vm176_vm0 = vcmask 130048   ;;  %s2267_s2 = inlined_call_operand.vmem [shape: bf16[16,128], index: 2, kind: input, shape index: {}]   ;;  %s2268_s0 = inlined_call_operand.vmem [shape: bf16[256,16], index: 0, kind: input, shape index: {}]   ;;  %s2269_s1 = inlined_call_operand.vmem [shape: bf16[256,256], index: 1, kind: input, shape index: {}]   ;;  %s2270_s4 = inlined_call_operand.vmem [shape: bf16[128,128], index: 4, kind: input, shape index: {}]   ;;  %s2271_s3 = inlined_call_operand.vmem [shape: f32[1,128], index: 3, kind: input, shape index: {}]   ;;  %s2272_s5 = inlined_call_operand.vmem [shape: f32[1,128], index: 5, kind: input, shape index: {}]   ;;  %s2273_s6 = inlined_call_operand.vmem [shape: f32[256,128], index: 6, kind: output, shape index: {}]  }
   0x1   :  { %v1661_v0 = vld [vmem:[%s2267_s2] sm:$0xff]   ;;  %v1663_v2 = vld [vmem:[%s2268_s0 + $0x8] sm:$0xff]   ;;  %v1664_v3 = vld [vmem:[%s2268_s0 + $0x10] sm:$0xff]  }
   0x2   :  { %v1662_v1 = vld [vmem:[%s2268_s0] sm:$0xff]   ;;  %1563 = vmatprep.subr.bf16.mxu0 %v1661_v0  ;;  %v1665_v4 = vld [vmem:[%s2268_s0 + $0x18] sm:$0xff]   ;;  %v1667_v6 = vld [vmem:[%s2268_s0 + $0x28] sm:$0xff]  }
   0x3   :  { %1564 = vmatpush3.bf16.msra.mxu0 %v1661_v0  ;;  %1565 = vmatprep.mubr.msk.bf16.mxu0 %vm176_vm0, %v1662_v1  ;;  %v1666_v5 = vld [vmem:[%s2268_s0 + $0x20] sm:$0xff]   ;;  %v1668_v7 = vld [vmem:[%s2268_s0 + $0x30] sm:$0xff]   ;;  %v1669_v8 = vld [vmem:[%s2268_s0 + $0x38] sm:$0xff]  }
   0x4   :  { %v1670_v9 = vld [vmem:[%s2268_s0 + $0x40] sm:$0xff]   ;;  %v1671_v10 = vld [vmem:[%s2268_s0 + $0x48] sm:$0xff]   ;;  %v1672_v11 = vld [vmem:[%s2268_s0 + $0x50] sm:$0xff]  }
   0x5   :  { %v1673_v12 = vld [vmem:[%s2268_s0 + $0x58] sm:$0xff]   ;;  %v1674_v13 = vld [vmem:[%s2268_s0 + $0x60] sm:$0xff]   ;;  %v1675_v14 = vld [vmem:[%s2268_s0 + $0x68] sm:$0xff]  }
   0x6   :  { %1566 = vmatmul.mubr.msk.bf16.vlgmr.msra.gmra.mxu0 %vm176_vm0, %v1663_v2  ;;  %v1676_v15 = vld [vmem:[%s2268_s0 + $0x70] sm:$0xff]   ;;  %v1677_v16 = vld [vmem:[%s2268_s0 + $0x78] sm:$0xff]   ;;  %v1839_v17 = vld [vmem:[%s2269_s1 + $0x4] ss:$8 sps:$4 sm:$0xff]  }
   0x7   :  { %1569 = vmatprep.mubr.msk.bf16.mxu0 %vm176_vm0, %v1664_v3  ;;  %601 = vmatprep.mubr.bf16.mxu1 %v1839_v17  ;;  %v1726_v2 = vld [vmem:[%s2270_s4 + $0x38] sm:$0xff]   ;;  %v1854_v3 = vld [vmem:[%s2269_s1] ss:$8 sps:$4 sm:$0xff]  }
   0x8   :  { %1597 = vmatprep.subr.bf16.mxu0 %v1726_v2 }
   0x9   :  { %1598 = vmatpush3.bf16.msra.mxu0 %v1726_v2 }
   0xe   :  { %1570 = vmatmul.mubr.msk.bf16.gmra.mxu0 %vm176_vm0, %v1665_v4  ;;  %v1727_v4 = vld [vmem:[%s2270_s4 + $0x30] sm:$0xff]  }
   0xf   :  { %1573 = vmatprep.mubr.msk.bf16.mxu0 %vm176_vm0, %v1666_v5  ;;  %v1862_v5 = vld [vmem:[%s2269_s1 + $0x14] ss:$8 sps:$4 sm:$0xff]   ;;  %1599 = vmatprep.subr.bf16.mxu0 %v1727_v4 }
  0x10   :  { %1600 = vmatpush3.bf16.msra.mxu0 %v1727_v4 }
  0x16   :  { %1574 = vmatmul.mubr.msk.bf16.gmra.mxu0 %vm176_vm0, %v1667_v6  ;;  %v1728_v6 = vld [vmem:[%s2270_s4 + $0x28] sm:$0xff]  }
  0x17   :  { %1577 = vmatprep.mubr.msk.bf16.mxu0 %vm176_vm0, %v1668_v7  ;;  %1601 = vmatprep.subr.bf16.mxu0 %v1728_v6  ;;  %v1875_v7 = vld [vmem:[%s2269_s1 + $0x10] ss:$8 sps:$4 sm:$0xff]  }
  0x18   :  { %1602 = vmatpush3.bf16.msra.mxu0 %v1728_v6 }
  0x1e   :  { %1578 = vmatmul.mubr.msk.bf16.gmra.mxu0 %vm176_vm0, %v1669_v8  ;;  %v1880_v8 = vld [vmem:[%s2269_s1 + $0x24] ss:$8 sps:$4 sm:$0xff]  }
  0x1f   :  { %1581 = vmatprep.mubr.msk.bf16.mxu0 %vm176_vm0, %v1670_v9  ;;  %v1887_v9 = vld [vmem:[%s2269_s1 + $0x20] ss:$8 sps:$4 sm:$0xff]  }
  0x26   :  { %1582 = vmatmul.mubr.msk.bf16.gmra.mxu0 %vm176_vm0, %v1671_v10  ;;  %v1892_v10 = vld [vmem:[%s2269_s1 + $0x34] ss:$8 sps:$4 sm:$0xff]  }
  0x27   :  { %1585 = vmatprep.mubr.msk.bf16.mxu0 %vm176_vm0, %v1672_v11  ;;  %v1899_v11 = vld [vmem:[%s2269_s1 + $0x30] ss:$8 sps:$4 sm:$0xff]  }
  0x2e   :  { %1586 = vmatmul.mubr.msk.bf16.gmra.mxu0 %vm176_vm0, %v1673_v12  ;;  %v1904_v12 = vld [vmem:[%s2269_s1 + $0x44] ss:$8 sps:$4 sm:$0xff]  }
  0x2f   :  { %1589 = vmatprep.mubr.msk.bf16.mxu0 %vm176_vm0, %v1674_v13  ;;  %v1911_v13 = vld [vmem:[%s2269_s1 + $0x40] ss:$8 sps:$4 sm:$0xff]  }
  0x36   :  { %1590 = vmatmul.mubr.msk.bf16.gmra.mxu0 %vm176_vm0, %v1675_v14  ;;  %v1916_v14 = vld [vmem:[%s2269_s1 + $0x54] ss:$8 sps:$4 sm:$0xff]  }
  0x37   :  { %1593 = vmatprep.mubr.msk.bf16.mxu0 %vm176_vm0, %v1676_v15  ;;  %v1923_v15 = vld [vmem:[%s2269_s1 + $0x50] ss:$8 sps:$4 sm:$0xff]  }
  0x3e   :  { %1594 = vmatmul.mubr.msk.bf16.gmra.mxu0 %vm176_vm0, %v1677_v16  ;;  %v1928_v16 = vld [vmem:[%s2269_s1 + $0x64] ss:$8 sps:$4 sm:$0xff]  }
  0xc6   :  { %v1567_v18 = vpop.f32.mrf.mxu0 }
  0xc8   :  { %v1842_v19 = vpop.f32.mrf.mxu0 }
  0xca   :  { %v1568_v20 = vpop.f32.mrf.mxu0 }
  0xcb   :  { %v387_v21 = vpack.c.bf16 %v1568_v20, %v1567_v18  ;;  %v1935_v18 = vld [vmem:[%s2269_s1 + $0x60] ss:$8 sps:$4 sm:$0xff]   ;;  %v1947_v20 = vld [vmem:[%s2269_s1 + $0x70] ss:$8 sps:$4 sm:$0xff]  }
  0xcc   :  { %v1844_v22 = vpop.f32.mrf.mxu0 }
  0xcd   :  { %v386_v23 = vpack.c.bf16 %v1844_v22, %v1842_v19  ;;  %v1940_v19 = vld [vmem:[%s2269_s1 + $0x74] ss:$8 sps:$4 sm:$0xff]   ;;  %v1959_v22 = vld [vmem:[%s2269_s1 + $0x80] ss:$8 sps:$4 sm:$0xff]  }
  0xce   :  { %v1571_v24 = vpop.f32.mrf.mxu0 }
  0xd0   :  { %v275_v25 = vpop.f32.mrf.mxu0 }
  0xd2   :  { %v1572_v26 = vpop.f32.mrf.mxu0 }
  0xd3   :  { %v389_v27 = vpack.c.bf16 %v1572_v26, %v1571_v24  ;;  %v1729_v24 = vld [vmem:[%s2270_s4 + $0x20] sm:$0xff]  }
  0xd4   :  { %v278_v28 = vpop.f32.mrf.mxu0  ;;  %1603 = vmatprep.subr.bf16.mxu0 %v1729_v24  ;;  %v1708_v26 = vld [vmem:[%s2269_s1 + $0xa4] ss:$8 sps:$4 sm:$0xff]  }
  0xd5   :  { %v388_v29 = vpack.c.bf16 %v278_v28, %v275_v25  ;;  %v1974_v25 = vld [vmem:[%s2269_s1 + $0x90] ss:$8 sps:$4 sm:$0xff]   ;;  %1604 = vmatpush3.bf16.msra.mxu0 %v1729_v24 }
  0xd6   :  { %v1575_v30 = vpop.f32.mrf.mxu0  ;;  %2275 = vst [vmem:[#allocation2_spill] sm:$0xff] %v1974_v25  ;;  %v1731_v28 = vld [vmem:[%s2270_s4 + $0x10] sm:$0xff]  }
  0xd8   :  { %v291_v31 = vpop.f32.mrf.mxu0 }
  0xda   :  { %v1576_v32 = vpop.f32.mrf.mxu0 }
  0xdb   :  { %v391_v59 = vpack.c.bf16 %v1576_v32, %v1575_v30  ;;  %v1994_v30 = vld [vmem:[%s2269_s1 + $0xb4] ss:$8 sps:$4 sm:$0xff]   ;;  %v1733_v32 = vld [vmem:[%s2270_s4] sm:$0xff]  }
  0xdc   :  { %v294_v33 = vpop.f32.mrf.mxu0 }
  0xdd   :  { %v390_v61 = vpack.c.bf16 %v294_v33, %v291_v31  ;;  %v1732_v31 = vld [vmem:[%s2270_s4 + $0x8] sm:$0xff]   ;;  %v2007_v33 = vld [vmem:[%s2269_s1 + $0xb0] ss:$8 sps:$4 sm:$0xff]  }
  0xde   :  { %v1579_v34 = vpop.f32.mrf.mxu0 }
  0xe0   :  { %v307_v35 = vpop.f32.mrf.mxu0 }
  0xe2   :  { %v1580_v36 = vpop.f32.mrf.mxu0 }
  0xe3   :  { %v393_v54 = vpack.c.bf16 %v1580_v36, %v1579_v34  ;;  %v2012_v34 = vld [vmem:[%s2269_s1 + $0xc4] ss:$8 sps:$4 sm:$0xff]   ;;  %v2024_v36 = vld [vmem:[%s2269_s1 + $0xd4] ss:$8 sps:$4 sm:$0xff]  }
  0xe4   :  { %v310_v37 = vpop.f32.mrf.mxu0 }
  0xe5   :  { %v392_v57 = vpack.c.bf16 %v310_v37, %v307_v35  ;;  %v2019_v35 = vld [vmem:[%s2269_s1 + $0xc0] ss:$8 sps:$4 sm:$0xff]   ;;  %v2031_v37 = vld [vmem:[%s2269_s1 + $0xd0] ss:$8 sps:$4 sm:$0xff]  }
  0xe6   :  { %v1583_v38 = vpop.f32.mrf.mxu0 }
  0xe8   :  { %v323_v39 = vpop.f32.mrf.mxu0 }
  0xea   :  { %v1584_v40 = vpop.f32.mrf.mxu0 }
  0xeb   :  { %v395_v0 = vpack.c.bf16 %v1584_v40, %v1583_v38  ;;  %v2036_v38 = vld [vmem:[%s2269_s1 + $0xe4] ss:$8 sps:$4 sm:$0xff]   ;;  %v2048_v40 = vld [vmem:[%s2269_s1 + $0xf4] ss:$8 sps:$4 sm:$0xff]  }
  0xec   :  { %v326_v41 = vpop.f32.mrf.mxu0 }
  0xed   :  { %v394_v1 = vpack.c.bf16 %v326_v41, %v323_v39  ;;  %v2043_v39 = vld [vmem:[%s2269_s1 + $0xe0] ss:$8 sps:$4 sm:$0xff]   ;;  %v2055_v41 = vld [vmem:[%s2269_s1 + $0xf0] ss:$8 sps:$4 sm:$0xff]  }
  0xee   :  { %v1587_v42 = vpop.f32.mrf.mxu0 }
  0xf0   :  { %v339_v43 = vpop.f32.mrf.mxu0 }
  0xf2   :  { %v1588_v44 = vpop.f32.mrf.mxu0 }
  0xf3   :  { %v397_v62 = vpack.c.bf16 %v1588_v44, %v1587_v42 }
  0xf4   :  { %v342_v45 = vpop.f32.mrf.mxu0 }
  0xf5   :  { %v396_v63 = vpack.c.bf16 %v342_v45, %v339_v43  ;;  %v2061_v45 = vld [vmem:[%s2271_s3] ss:$0 sm:$0xff] }
  0xf6   :  { %v1591_v46 = vpop.f32.mrf.mxu0 }
  0xf8   :  { %v355_v47 = vpop.f32.mrf.mxu0 }
  0xfa   :  { %v1592_v48 = vpop.f32.mrf.mxu0 }
  0xfb   :  { %v399_v58 = vpack.c.bf16 %v1592_v48, %v1591_v46 }
  0xfc   :  { %v358_v49 = vpop.f32.mrf.mxu0 }
  0xfd   :  { %v398_v60 = vpack.c.bf16 %v358_v49, %v355_v47 }
  0xfe   :  { %v1595_v50 = vpop.f32.mrf.mxu0 }
 0x100   :  { %v371_v51 = vpop.f32.mrf.mxu0 }
 0x102   :  { %v1596_v52 = vpop.f32.mrf.mxu0 }
 0x103   :  { %v401_v53 = vpack.c.bf16 %v1596_v52, %v1595_v50 }
 0x104   :  { %v374_v55 = vpop.f32.mrf.mxu0 }
 0x105   :  { %v400_v56 = vpack.c.bf16 %v374_v55, %v371_v51  ;;  %1315 = vmatprep.subr.bf16.mxu1 %v401_v53 }
 0x106   :  { %1316 = vmatpush3.bf16.msra.mxu1 %v393_v54 }
 0x107   :  { %1317 = vmatprep.subr.bf16.mxu1 %v400_v56 }
 0x10a   :  { %1318 = vmatpush3.bf16.msra.mxu1 %v392_v57 }
 0x10b   :  { %1319 = vmatprep.subr.bf16.mxu1 %v399_v58 }
 0x10e   :  { %1320 = vmatpush3.bf16.msra.mxu1 %v391_v59 }
 0x10f   :  { %1321 = vmatprep.subr.bf16.mxu1 %v398_v60 }
 0x112   :  { %1322 = vmatpush3.bf16.msra.mxu1 %v390_v61 }
 0x113   :  { %1323 = vmatprep.subr.bf16.mxu1 %v397_v62 }
 0x116   :  { %1324 = vmatpush3.bf16.msra.mxu1 %v389_v27  ;;  %v1730_v27 = vld [vmem:[%s2270_s4 + $0x18] sm:$0xff]  }
 0x117   :  { %1325 = vmatprep.subr.bf16.mxu1 %v396_v63  ;;  %1605 = vmatprep.subr.bf16.mxu0 %v1730_v27 }
 0x118   :  { %1606 = vmatpush3.bf16.msra.mxu0 %v1730_v27 }
 0x119   :  { %1607 = vmatprep.subr.bf16.mxu0 %v1731_v28 }
 0x11a   :  { %1326 = vmatpush3.bf16.msra.mxu1 %v388_v29  ;;  %v1989_v29 = vld [vmem:[%s2269_s1 + $0xa0] ss:$8 sps:$4 sm:$0xff]  }
 0x11b   :  { %1327 = vmatprep.subr.bf16.mxu1 %v395_v0 }
 0x11c   :  { %1608 = vmatpush3.bf16.msra.mxu0 %v1731_v28 }
 0x11d   :  { %1609 = vmatprep.subr.bf16.mxu0 %v1732_v31 }
 0x11e   :  { %1328 = vmatpush3.bf16.msra.mxu1 %v387_v21  ;;  %v1952_v21 = vld [vmem:[%s2269_s1 + $0x84] ss:$8 sps:$4 sm:$0xff]  }
 0x11f   :  { %1329 = vmatprep.subr.bf16.mxu1 %v394_v1 }
 0x120   :  { %1610 = vmatpush3.bf16.msra.mxu0 %v1732_v31 }
 0x121   :  { %1611 = vmatprep.subr.bf16.mxu0 %v1733_v32 }
 0x122   :  { %1330 = vmatpush3.bf16.msra.mxu1 %v386_v23  ;;  %v1964_v23 = vld [vmem:[%s2269_s1 + $0x94] ss:$8 sps:$4 sm:$0xff]  }
 0x124   :  { %1612 = vmatpush3.bf16.msra.mxu0 %v1733_v32 }
 0x125   :  { %602 = vmatmul.mubr.bf16.vlgmr.msra.gmra.mxu1 %v1854_v3 }
 0x126   :  { %609 = vmatprep.mubr.bf16.mxu1 %v1862_v5 }
 0x12d   :  { %610 = vmatmul.mubr.bf16.gmra.mxu1 %v1875_v7 }
 0x12e   :  { %617 = vmatprep.mubr.bf16.mxu1 %v1880_v8 }
 0x135   :  { %618 = vmatmul.mubr.bf16.gmra.mxu1 %v1887_v9 }
 0x136   :  { %625 = vmatprep.mubr.bf16.mxu1 %v1892_v10 }
 0x13d   :  { %626 = vmatmul.mubr.bf16.gmra.mxu1 %v1899_v11 }
 0x13e   :  { %633 = vmatprep.mubr.bf16.mxu1 %v1904_v12 }
 0x145   :  { %634 = vmatmul.mubr.bf16.gmra.mxu1 %v1911_v13 }
 0x146   :  { %641 = vmatprep.mubr.bf16.mxu1 %v1916_v14 }
 0x14d   :  { %642 = vmatmul.mubr.bf16.gmra.mxu1 %v1923_v15 }
 0x14e   :  { %649 = vmatprep.mubr.bf16.mxu1 %v1928_v16 }
 0x155   :  { %650 = vmatmul.mubr.bf16.gmra.mxu1 %v1935_v18 }
 0x156   :  { %657 = vmatprep.mubr.bf16.mxu1 %v1940_v19 }
 0x15d   :  { %658 = vmatmul.mubr.bf16.gmra.mxu1 %v1947_v20 }
 0x15e   :  { %665 = vmatprep.mubr.bf16.mxu1 %v1952_v21 }
 0x165   :  { %666 = vmatmul.mubr.bf16.gmra.mxu1 %v1959_v22 }
 0x166   :  { %673 = vmatprep.mubr.bf16.mxu1 %v1964_v23 }
 0x16d   :  { %674 = vmatmul.mubr.bf16.gmra.mxu1 %v1974_v25 }
 0x16e   :  { %681 = vmatprep.mubr.bf16.mxu1 %v1708_v26 }
 0x175   :  { %682 = vmatmul.mubr.bf16.gmra.mxu1 %v1989_v29 }
 0x176   :  { %689 = vmatprep.mubr.bf16.mxu1 %v1994_v30 }
 0x17d   :  { %690 = vmatmul.mubr.bf16.gmra.mxu1 %v2007_v33 }
 0x17e   :  { %697 = vmatprep.mubr.bf16.mxu1 %v2012_v34 }
 0x185   :  { %698 = vmatmul.mubr.bf16.gmra.mxu1 %v2019_v35 }
 0x186   :  { %705 = vmatprep.mubr.bf16.mxu1 %v2024_v36 }
 0x18d   :  { %706 = vmatmul.mubr.bf16.gmra.mxu1 %v2031_v37 }
 0x18e   :  { %713 = vmatprep.mubr.bf16.mxu1 %v2036_v38 }
 0x195   :  { %714 = vmatmul.mubr.bf16.gmra.mxu1 %v2043_v39 }
 0x196   :  { %721 = vmatprep.mubr.bf16.mxu1 %v2048_v40 }
 0x19d   :  { %722 = vmatmul.mubr.bf16.gmra.mxu1 %v2055_v41 }
 0x19e   :  { %1138 = vmatprep.mubr.bf16.mxu1 %v1708_v26 }
 0x1e5   :  { %v1331_v42 = vpop.f32.mrf.mxu1 }
 0x1e7   :  { %v1332_v43 = vpop.f32.mrf.mxu1 }
 0x1e8   :  { %v1333_v44 = vadd.f32 %v1332_v43, %v1331_v42 }
 0x1e9   :  { %v1334_v46 = vpop.f32.mrf.mxu1 }
 0x1ea   :  { %v604_v48 = vadd.f32 %v1333_v44, %v2061_v45 }
 0x1eb   :  { %v1335_v47 = vpop.f32.mrf.mxu1 }
 0x1ec   :  { %v1336_v49 = vadd.f32 %v1335_v47, %v1334_v46  ;;  %v730_v53 = vmax.f32 %v604_v48, 0.0 }
 0x1ed   :  { %v1337_v50 = vpop.f32.mrf.mxu1 }
 0x1ee   :  { %v607_v51 = vadd.f32 %v1336_v49, %v2061_v45 }
 0x1ef   :  { %v1338_v52 = vpop.f32.mrf.mxu1 }
 0x1f0   :  { %v731_v54 = vmax.f32 %v607_v51, 0.0  ;;  %v1339_v55 = vadd.f32 %v1338_v52, %v1337_v50 }
 0x1f1   :  { %v1340_v56 = vpop.f32.mrf.mxu1 }
 0x1f2   :  { %v762_v57 = vpack.c.bf16 %v731_v54, %v730_v53  ;;  %v612_v59 = vadd.f32 %v1339_v55, %v2061_v45 }
 0x1f3   :  { %v1341_v58 = vpop.f32.mrf.mxu1 }
 0x1f4   :  { %v1342_v60 = vadd.f32 %v1341_v58, %v1340_v56  ;;  %1613 = vmatprep.mubr.bf16.mxu0 %v762_v57  ;;  %v732_v0 = vmax.f32 %v612_v59, 0.0 }
 0x1f5   :  { %v1343_v61 = vpop.f32.mrf.mxu1 }
 0x1f6   :  { %v615_v62 = vadd.f32 %v1342_v60, %v2061_v45 }
 0x1f7   :  { %v1344_v63 = vpop.f32.mrf.mxu1 }
 0x1f8   :  { %v733_v1 = vmax.f32 %v615_v62, 0.0  ;;  %v1345_v2 = vadd.f32 %v1344_v63, %v1343_v61 }
 0x1f9   :  { %v1346_v4 = vpop.f32.mrf.mxu1 }
 0x1fa   :  { %v763_v6 = vpack.c.bf16 %v733_v1, %v732_v0  ;;  %v620_v26 = vadd.f32 %v1345_v2, %v2061_v45 }
 0x1fb   :  { %v1347_v24 = vpop.f32.mrf.mxu1 }
 0x1fc   :  { %v1348_v27 = vadd.f32 %v1347_v24, %v1346_v4  ;;  %1614 = vmatmul.mubr.bf16.vlgmr.msra.gmra.mxu0 %v763_v6  ;;  %v734_v42 = vmax.f32 %v620_v26, 0.0 }
 0x1fd   :  { %v1349_v28 = vpop.f32.mrf.mxu1 }
 0x1fe   :  { %v623_v31 = vadd.f32 %v1348_v27, %v2061_v45 }
 0x1ff   :  { %v1350_v32 = vpop.f32.mrf.mxu1 }
 0x200   :  { %v735_v43 = vmax.f32 %v623_v31, 0.0  ;;  %v1351_v44 = vadd.f32 %v1350_v32, %v1349_v28 }
 0x201   :  { %v1352_v46 = vpop.f32.mrf.mxu1 }
 0x202   :  { %v764_v47 = vpack.c.bf16 %v735_v43, %v734_v42  ;;  %v628_v49 = vadd.f32 %v1351_v44, %v2061_v45 }
 0x203   :  { %v1353_v48 = vpop.f32.mrf.mxu1 }
 0x204   :  { %v1354_v50 = vadd.f32 %v1353_v48, %v1352_v46  ;;  %1617 = vmatprep.mubr.bf16.mxu0 %v764_v47  ;;  %v736_v54 = vmax.f32 %v628_v49, 0.0 }
 0x205   :  { %v1355_v51 = vpop.f32.mrf.mxu1 }
 0x206   :  { %v631_v52 = vadd.f32 %v1354_v50, %v2061_v45 }
 0x207   :  { %v1356_v53 = vpop.f32.mrf.mxu1 }
 0x208   :  { %v737_v55 = vmax.f32 %v631_v52, 0.0  ;;  %v1357_v56 = vadd.f32 %v1356_v53, %v1355_v51 }
 0x209   :  { %v1358_v57 = vpop.f32.mrf.mxu1 }
 0x20a   :  { %v765_v58 = vpack.c.bf16 %v737_v55, %v736_v54  ;;  %v636_v60 = vadd.f32 %v1357_v56, %v2061_v45 }
 0x20b   :  { %v1359_v59 = vpop.f32.mrf.mxu1 }
 0x20c   :  { %v1360_v61 = vadd.f32 %v1359_v59, %v1358_v57  ;;  %1618 = vmatmul.mubr.bf16.gmra.mxu0 %v765_v58  ;;  %v738_v1 = vmax.f32 %v636_v60, 0.0 }
 0x20d   :  { %v1361_v62 = vpop.f32.mrf.mxu1 }
 0x20e   :  { %v639_v63 = vadd.f32 %v1360_v61, %v2061_v45 }
 0x20f   :  { %v1362_v0 = vpop.f32.mrf.mxu1 }
 0x210   :  { %v739_v2 = vmax.f32 %v639_v63, 0.0  ;;  %v1363_v4 = vadd.f32 %v1362_v0, %v1361_v62 }
 0x211   :  { %v1364_v6 = vpop.f32.mrf.mxu1 }
 0x212   :  { %v766_v24 = vpack.c.bf16 %v739_v2, %v738_v1  ;;  %v644_v27 = vadd.f32 %v1363_v4, %v2061_v45 }
 0x213   :  { %v1365_v26 = vpop.f32.mrf.mxu1 }
 0x214   :  { %v1366_v28 = vadd.f32 %v1365_v26, %v1364_v6  ;;  %1621 = vmatprep.mubr.bf16.mxu0 %v766_v24  ;;  %v740_v43 = vmax.f32 %v644_v27, 0.0 }
 0x215   :  { %v1367_v31 = vpop.f32.mrf.mxu1 }
 0x216   :  { %v647_v32 = vadd.f32 %v1366_v28, %v2061_v45 }
 0x217   :  { %v1368_v42 = vpop.f32.mrf.mxu1 }
 0x218   :  { %v741_v44 = vmax.f32 %v647_v32, 0.0  ;;  %v1369_v46 = vadd.f32 %v1368_v42, %v1367_v31 }
 0x219   :  { %v1370_v47 = vpop.f32.mrf.mxu1 }
 0x21a   :  { %v767_v48 = vpack.c.bf16 %v741_v44, %v740_v43  ;;  %v652_v50 = vadd.f32 %v1369_v46, %v2061_v45 }
 0x21b   :  { %v1371_v49 = vpop.f32.mrf.mxu1 }
 0x21c   :  { %v1372_v51 = vadd.f32 %v1371_v49, %v1370_v47  ;;  %1622 = vmatmul.mubr.bf16.gmra.mxu0 %v767_v48  ;;  %v742_v55 = vmax.f32 %v652_v50, 0.0 }
 0x21d   :  { %v1373_v52 = vpop.f32.mrf.mxu1 }
 0x21e   :  { %v655_v53 = vadd.f32 %v1372_v51, %v2061_v45 }
 0x21f   :  { %v1374_v54 = vpop.f32.mrf.mxu1 }
 0x220   :  { %v743_v56 = vmax.f32 %v655_v53, 0.0  ;;  %v1375_v57 = vadd.f32 %v1374_v54, %v1373_v52 }
 0x221   :  { %v1376_v58 = vpop.f32.mrf.mxu1 }
 0x222   :  { %v768_v59 = vpack.c.bf16 %v743_v56, %v742_v55  ;;  %v660_v61 = vadd.f32 %v1375_v57, %v2061_v45 }
 0x223   :  { %v1377_v60 = vpop.f32.mrf.mxu1 }
 0x224   :  { %v1378_v62 = vadd.f32 %v1377_v60, %v1376_v58  ;;  %1625 = vmatprep.mubr.bf16.mxu0 %v768_v59  ;;  %v744_v2 = vmax.f32 %v660_v61, 0.0 }
 0x225   :  { %v1379_v63 = vpop.f32.mrf.mxu1 }
 0x226   :  { %v663_v0 = vadd.f32 %v1378_v62, %v2061_v45 }
 0x227   :  { %v1380_v1 = vpop.f32.mrf.mxu1 }
 0x228   :  { %v745_v4 = vmax.f32 %v663_v0, 0.0  ;;  %v1381_v6 = vadd.f32 %v1380_v1, %v1379_v63 }
 0x229   :  { %v1382_v24 = vpop.f32.mrf.mxu1 }
 0x22a   :  { %v769_v26 = vpack.c.bf16 %v745_v4, %v744_v2  ;;  %v668_v28 = vadd.f32 %v1381_v6, %v2061_v45 }
 0x22b   :  { %v1383_v27 = vpop.f32.mrf.mxu1 }
 0x22c   :  { %v1384_v31 = vadd.f32 %v1383_v27, %v1382_v24  ;;  %1626 = vmatmul.mubr.bf16.gmra.mxu0 %v769_v26  ;;  %v746_v44 = vmax.f32 %v668_v28, 0.0 }
 0x22d   :  { %v1385_v32 = vpop.f32.mrf.mxu1 }
 0x22e   :  { %v671_v42 = vadd.f32 %v1384_v31, %v2061_v45 }
 0x22f   :  { %v1386_v43 = vpop.f32.mrf.mxu1 }
 0x230   :  { %v747_v46 = vmax.f32 %v671_v42, 0.0  ;;  %v1387_v47 = vadd.f32 %v1386_v43, %v1385_v32 }
 0x231   :  { %v1388_v48 = vpop.f32.mrf.mxu1 }
 0x232   :  { %v770_v49 = vpack.c.bf16 %v747_v46, %v746_v44  ;;  %v676_v51 = vadd.f32 %v1387_v47, %v2061_v45 }
 0x233   :  { %v1389_v50 = vpop.f32.mrf.mxu1 }
 0x234   :  { %v1390_v52 = vadd.f32 %v1389_v50, %v1388_v48  ;;  %1629 = vmatprep.mubr.bf16.mxu0 %v770_v49  ;;  %v748_v56 = vmax.f32 %v676_v51, 0.0 }
 0x235   :  { %v1391_v53 = vpop.f32.mrf.mxu1 }
 0x236   :  { %v679_v54 = vadd.f32 %v1390_v52, %v2061_v45 }
 0x237   :  { %v1392_v55 = vpop.f32.mrf.mxu1 }
 0x238   :  { %v749_v57 = vmax.f32 %v679_v54, 0.0  ;;  %v1393_v58 = vadd.f32 %v1392_v55, %v1391_v53 }
 0x239   :  { %v1394_v59 = vpop.f32.mrf.mxu1 }
 0x23a   :  { %v771_v60 = vpack.c.bf16 %v749_v57, %v748_v56  ;;  %v684_v62 = vadd.f32 %v1393_v58, %v2061_v45 }
 0x23b   :  { %v1395_v61 = vpop.f32.mrf.mxu1 }
 0x23c   :  { %v1396_v63 = vadd.f32 %v1395_v61, %v1394_v59  ;;  %1630 = vmatmul.mubr.bf16.gmra.mxu0 %v771_v60  ;;  %v750_v4 = vmax.f32 %v684_v62, 0.0 }
 0x23d   :  { %v1397_v0 = vpop.f32.mrf.mxu1 }
 0x23e   :  { %v687_v1 = vadd.f32 %v1396_v63, %v2061_v45 }
 0x23f   :  { %v1398_v2 = vpop.f32.mrf.mxu1 }
 0x240   :  { %v751_v6 = vmax.f32 %v687_v1, 0.0  ;;  %v1399_v24 = vadd.f32 %v1398_v2, %v1397_v0 }
 0x241   :  { %v1400_v26 = vpop.f32.mrf.mxu1 }
 0x242   :  { %v772_v27 = vpack.c.bf16 %v751_v6, %v750_v4  ;;  %v692_v31 = vadd.f32 %v1399_v24, %v2061_v45 }
 0x243   :  { %v1401_v28 = vpop.f32.mrf.mxu1 }
 0x244   :  { %v1402_v32 = vadd.f32 %v1401_v28, %v1400_v26  ;;  %1633 = vmatprep.mubr.bf16.mxu0 %v772_v27  ;;  %v752_v46 = vmax.f32 %v692_v31, 0.0 }
 0x245   :  { %v1403_v42 = vpop.f32.mrf.mxu1 }
 0x246   :  { %v695_v43 = vadd.f32 %v1402_v32, %v2061_v45 }
 0x247   :  { %v1404_v44 = vpop.f32.mrf.mxu1 }
 0x248   :  { %v753_v47 = vmax.f32 %v695_v43, 0.0  ;;  %v1405_v48 = vadd.f32 %v1404_v44, %v1403_v42 }
 0x249   :  { %v1406_v49 = vpop.f32.mrf.mxu1 }
 0x24a   :  { %v773_v50 = vpack.c.bf16 %v753_v47, %v752_v46  ;;  %v700_v52 = vadd.f32 %v1405_v48, %v2061_v45 }
 0x24b   :  { %v1407_v51 = vpop.f32.mrf.mxu1 }
 0x24c   :  { %v1408_v53 = vadd.f32 %v1407_v51, %v1406_v49  ;;  %1634 = vmatmul.mubr.bf16.gmra.mxu0 %v773_v50  ;;  %v754_v57 = vmax.f32 %v700_v52, 0.0 }
 0x24d   :  { %v1409_v54 = vpop.f32.mrf.mxu1 }
 0x24e   :  { %v703_v55 = vadd.f32 %v1408_v53, %v2061_v45 }
 0x24f   :  { %v1410_v56 = vpop.f32.mrf.mxu1 }
 0x250   :  { %v755_v58 = vmax.f32 %v703_v55, 0.0  ;;  %v1411_v59 = vadd.f32 %v1410_v56, %v1409_v54 }
 0x251   :  { %v1412_v60 = vpop.f32.mrf.mxu1 }
 0x252   :  { %v774_v61 = vpack.c.bf16 %v755_v58, %v754_v57  ;;  %v708_v63 = vadd.f32 %v1411_v59, %v2061_v45 }
 0x253   :  { %v1413_v62 = vpop.f32.mrf.mxu1 }
 0x254   :  { %v1414_v0 = vadd.f32 %v1413_v62, %v1412_v60  ;;  %1637 = vmatprep.mubr.bf16.mxu0 %v774_v61  ;;  %v756_v6 = vmax.f32 %v708_v63, 0.0 }
 0x255   :  { %v1415_v1 = vpop.f32.mrf.mxu1 }
 0x256   :  { %v711_v2 = vadd.f32 %v1414_v0, %v2061_v45 }
 0x257   :  { %v1416_v4 = vpop.f32.mrf.mxu1 }
 0x258   :  { %v757_v24 = vmax.f32 %v711_v2, 0.0  ;;  %v1417_v26 = vadd.f32 %v1416_v4, %v1415_v1 }
 0x259   :  { %v1418_v27 = vpop.f32.mrf.mxu1 }
 0x25a   :  { %v775_v28 = vpack.c.bf16 %v757_v24, %v756_v6  ;;  %v716_v32 = vadd.f32 %v1417_v26, %v2061_v45 }
 0x25b   :  { %v1419_v31 = vpop.f32.mrf.mxu1 }
 0x25c   :  { %v1420_v42 = vadd.f32 %v1419_v31, %v1418_v27  ;;  %1638 = vmatmul.mubr.bf16.gmra.mxu0 %v775_v28  ;;  %v758_v47 = vmax.f32 %v716_v32, 0.0 }
 0x25d   :  { %v1421_v43 = vpop.f32.mrf.mxu1 }
 0x25e   :  { %v719_v44 = vadd.f32 %v1420_v42, %v2061_v45 }
 0x25f   :  { %v1422_v46 = vpop.f32.mrf.mxu1 }
 0x260   :  { %v759_v48 = vmax.f32 %v719_v44, 0.0  ;;  %v1423_v49 = vadd.f32 %v1422_v46, %v1421_v43 }
 0x261   :  { %v1424_v50 = vpop.f32.mrf.mxu1 }
 0x262   :  { %v776_v51 = vpack.c.bf16 %v759_v48, %v758_v47  ;;  %v724_v53 = vadd.f32 %v1423_v49, %v2061_v45 }
 0x263   :  { %v1425_v52 = vpop.f32.mrf.mxu1 }
 0x264   :  { %v1426_v54 = vadd.f32 %v1425_v52, %v1424_v50  ;;  %1641 = vmatprep.mubr.bf16.mxu0 %v776_v51  ;;  %v760_v56 = vmax.f32 %v724_v53, 0.0 }
 0x266   :  { %v727_v55 = vadd.f32 %v1426_v54, %v2061_v45 }
 0x268   :  { %v761_v57 = vmax.f32 %v727_v55, 0.0 }
 0x26a   :  { %v777_v58 = vpack.c.bf16 %v761_v57, %v760_v56 }
 0x26c   :  { %1642 = vmatmul.mubr.bf16.gmra.mxu0 %v777_v58 }
 0x26d   :  { %1058 = vmatprep.mubr.bf16.mxu0 %v1839_v17 }
 0x2bc   :  { %v1615_v59 = vpop.f32.mrf.mxu0 }
 0x2be   :  { %v876_v60 = vpop.f32.mrf.mxu0 }
 0x2c0   :  { %v1616_v61 = vpop.f32.mrf.mxu0 }
 0x2c1   :  { %v2096_v62 = vpack.c.bf16 %v1616_v61, %v1615_v59 }
 0x2c2   :  { %v879_v63 = vpop.f32.mrf.mxu0 }
 0x2c3   :  { %v2098_v0 = vpack.c.bf16 %v879_v63, %v876_v60 }
 0x2cc   :  { %v1619_v1 = vpop.f32.mrf.mxu0 }
 0x2ce   :  { %v892_v2 = vpop.f32.mrf.mxu0 }
 0x2d0   :  { %v1620_v4 = vpop.f32.mrf.mxu0 }
 0x2d1   :  { %v1006_v6 = vpack.c.bf16 %v1620_v4, %v1619_v1 }
 0x2d2   :  { %v895_v24 = vpop.f32.mrf.mxu0 }
 0x2d3   :  { %v1005_v45 = vpack.c.bf16 %v895_v24, %v892_v2 }
 0x2dc   :  { %v1623_v26 = vpop.f32.mrf.mxu0 }
 0x2de   :  { %v908_v27 = vpop.f32.mrf.mxu0 }
 0x2e0   :  { %v1624_v28 = vpop.f32.mrf.mxu0 }
 0x2e1   :  { %v1008_v24 = vpack.c.bf16 %v1624_v28, %v1623_v26 }
 0x2e2   :  { %v911_v31 = vpop.f32.mrf.mxu0 }
 0x2ec   :  { %v1627_v32 = vpop.f32.mrf.mxu0 }
 0x2ee   :  { %v924_v17 = vpop.f32.mrf.mxu0 }
 0x2f0   :  { %v1628_v42 = vpop.f32.mrf.mxu0 }
 0x2f1   :  { %v1010_v61 = vpack.c.bf16 %v1628_v42, %v1627_v32  ;;  %v1007_v32 = vpack.c.bf16 %v911_v31, %v908_v27 }
 0x2f2   :  { %v927_v43 = vpop.f32.mrf.mxu0 }
 0x2f3   :  { %v1009_v2 = vpack.c.bf16 %v927_v43, %v924_v17 }
 0x2fc   :  { %v1631_v44 = vpop.f32.mrf.mxu0 }
 0x2fe   :  { %v940_v46 = vpop.f32.mrf.mxu0 }
 0x300   :  { %v1632_v47 = vpop.f32.mrf.mxu0 }
 0x301   :  { %v1012_v17 = vpack.c.bf16 %v1632_v47, %v1631_v44 }
 0x302   :  { %v943_v48 = vpop.f32.mrf.mxu0 }
 0x303   :  { %v1011_v26 = vpack.c.bf16 %v943_v48, %v940_v46 }
 0x30c   :  { %v1635_v49 = vpop.f32.mrf.mxu0 }
 0x30e   :  { %v956_v50 = vpop.f32.mrf.mxu0 }
 0x310   :  { %v1636_v51 = vpop.f32.mrf.mxu0 }
 0x311   :  { %v1014_v42 = vpack.c.bf16 %v1636_v51, %v1635_v49 }
 0x312   :  { %v959_v52 = vpop.f32.mrf.mxu0 }
 0x31c   :  { %v1639_v53 = vpop.f32.mrf.mxu0 }
 0x31e   :  { %v972_v54 = vpop.f32.mrf.mxu0 }
 0x320   :  { %v1640_v55 = vpop.f32.mrf.mxu0 }
 0x321   :  { %v1016_v4 = vpack.c.bf16 %v1640_v55, %v1639_v53 }
 0x322   :  { %v975_v56 = vpop.f32.mrf.mxu0 }
 0x323   :  { %v1015_v25 = vpack.c.bf16 %v975_v56, %v972_v54 }
 0x32c   :  { %v1643_v57 = vpop.f32.mrf.mxu0 }
 0x32e   :  { %v988_v58 = vpop.f32.mrf.mxu0 }
 0x330   :  { %v1644_v59 = vpop.f32.mrf.mxu0 }
 0x331   :  { %v1018_v60 = vpack.c.bf16 %v1644_v59, %v1643_v57  ;;  %v1013_v57 = vpack.c.bf16 %v959_v52, %v956_v50 }
 0x332   :  { %v991_v63 = vpop.f32.mrf.mxu0 }
 0x333   :  { %v1017_v1 = vpack.c.bf16 %v991_v63, %v988_v58  ;;  %1451 = vmatprep.subr.bf16.mxu0 %v1018_v60  ;;  %1645 = vmatprep.subr.bf16.mxu1 %v1018_v60 }
 0x334   :  { %1452 = vmatpush3.bf16.msra.mxu0 %v1010_v61  ;;  %1653 = vmatpush3.bf16.msra.mxu1 %v1010_v61 }
 0x335   :  { %1453 = vmatprep.subr.bf16.mxu0 %v1017_v1  ;;  %1646 = vmatprep.subr.bf16.mxu1 %v1017_v1 }
 0x338   :  { %1454 = vmatpush3.bf16.msra.mxu0 %v1009_v2  ;;  %1654 = vmatpush3.bf16.msra.mxu1 %v1009_v2 }
 0x339   :  { %1455 = vmatprep.subr.bf16.mxu0 %v1016_v4  ;;  %1647 = vmatprep.subr.bf16.mxu1 %v1016_v4 }
 0x33c   :  { %1456 = vmatpush3.bf16.msra.mxu0 %v1008_v24  ;;  %1655 = vmatpush3.bf16.msra.mxu1 %v1008_v24 }
 0x33d   :  { %1457 = vmatprep.subr.bf16.mxu0 %v1015_v25  ;;  %1648 = vmatprep.subr.bf16.mxu1 %v1015_v25 }
 0x340   :  { %1458 = vmatpush3.bf16.msra.mxu0 %v1007_v32  ;;  %1656 = vmatpush3.bf16.msra.mxu1 %v1007_v32 }
 0x341   :  { %1459 = vmatprep.subr.bf16.mxu0 %v1014_v42  ;;  %1649 = vmatprep.subr.bf16.mxu1 %v1014_v42 }
 0x344   :  { %1460 = vmatpush3.bf16.msra.mxu0 %v1006_v6  ;;  %1657 = vmatpush3.bf16.msra.mxu1 %v1006_v6 }
 0x345   :  { %1461 = vmatprep.subr.bf16.mxu0 %v1013_v57  ;;  %1650 = vmatprep.subr.bf16.mxu1 %v1013_v57 }
 0x348   :  { %1462 = vmatpush3.bf16.msra.mxu0 %v1005_v45  ;;  %1658 = vmatpush3.bf16.msra.mxu1 %v1005_v45 }
 0x349   :  { %1463 = vmatprep.subr.bf16.mxu0 %v1012_v17  ;;  %1651 = vmatprep.subr.bf16.mxu1 %v1012_v17 }
 0x34c   :  { %1464 = vmatpush3.bf16.msra.mxu0 %v2096_v62  ;;  %1659 = vmatpush3.bf16.msra.mxu1 %v2096_v62 }
 0x34d   :  { %1465 = vmatprep.subr.bf16.mxu0 %v1011_v26  ;;  %1652 = vmatprep.subr.bf16.mxu1 %v1011_v26 }
 0x350   :  { %1466 = vmatpush3.bf16.msra.mxu0 %v2098_v0  ;;  %1660 = vmatpush3.bf16.msra.mxu1 %v2098_v0 }
 0x353   :  { %1059 = vmatmul.mubr.bf16.vlgmr.msra.gmra.mxu0 %v1854_v3  ;;  %1139 = vmatmul.mubr.bf16.vlgmr.msra.gmra.mxu1 %v1989_v29  ;;  %v2276_v3 = vld [vmem:[#allocation2_spill] sm:$0xff] }
 0x354   :  { %1066 = vmatprep.mubr.bf16.mxu0 %v1862_v5  ;;  %1146 = vmatprep.mubr.bf16.mxu1 %v1994_v30 }
 0x35b   :  { %1067 = vmatmul.mubr.bf16.gmra.mxu0 %v1875_v7  ;;  %1147 = vmatmul.mubr.bf16.gmra.mxu1 %v2007_v33 }
 0x35c   :  { %1074 = vmatprep.mubr.bf16.mxu0 %v1880_v8  ;;  %1154 = vmatprep.mubr.bf16.mxu1 %v2012_v34  ;;  %v2137_v8 = vld [vmem:[%s2272_s5] ss:$0 sm:$0xff] }
 0x363   :  { %1075 = vmatmul.mubr.bf16.gmra.mxu0 %v1887_v9  ;;  %1155 = vmatmul.mubr.bf16.gmra.mxu1 %v2019_v35 }
 0x364   :  { %1082 = vmatprep.mubr.bf16.mxu0 %v1892_v10  ;;  %1162 = vmatprep.mubr.bf16.mxu1 %v2024_v36 }
 0x36b   :  { %1083 = vmatmul.mubr.bf16.gmra.mxu0 %v1899_v11  ;;  %1163 = vmatmul.mubr.bf16.gmra.mxu1 %v2031_v37 }
 0x36c   :  { %1090 = vmatprep.mubr.bf16.mxu0 %v1904_v12  ;;  %1170 = vmatprep.mubr.bf16.mxu1 %v2036_v38 }
 0x373   :  { %1091 = vmatmul.mubr.bf16.gmra.mxu0 %v1911_v13  ;;  %1171 = vmatmul.mubr.bf16.gmra.mxu1 %v2043_v39 }
 0x374   :  { %1098 = vmatprep.mubr.bf16.mxu0 %v1916_v14  ;;  %1178 = vmatprep.mubr.bf16.mxu1 %v2048_v40 }
 0x37b   :  { %1099 = vmatmul.mubr.bf16.gmra.mxu0 %v1923_v15  ;;  %1179 = vmatmul.mubr.bf16.gmra.mxu1 %v2055_v41 }
 0x37c   :  { %1106 = vmatprep.mubr.bf16.mxu0 %v1928_v16 }
 0x383   :  { %1107 = vmatmul.mubr.bf16.gmra.mxu0 %v1935_v18 }
 0x384   :  { %1114 = vmatprep.mubr.bf16.mxu0 %v1940_v19 }
 0x38b   :  { %1115 = vmatmul.mubr.bf16.gmra.mxu0 %v1947_v20 }
 0x38c   :  { %1122 = vmatprep.mubr.bf16.mxu0 %v1952_v21 }
 0x393   :  { %1123 = vmatmul.mubr.bf16.gmra.mxu0 %v1959_v22 }
 0x394   :  { %1130 = vmatprep.mubr.bf16.mxu0 %v1964_v23 }
 0x39b   :  { %1131 = vmatmul.mubr.bf16.gmra.mxu0 %v2276_v3 }
 0x413   :  { %v1467_v5 = vpop.f32.mrf.mxu0  ;;  %v1527_v7 = vpop.f32.mrf.mxu1 }
 0x415   :  { %v1468_v9 = vpop.f32.mrf.mxu0  ;;  %v1528_v10 = vpop.f32.mrf.mxu1 }
 0x416   :  { %v1469_v11 = vadd.f32 %v1468_v9, %v1467_v5  ;;  %v1529_v12 = vadd.f32 %v1528_v10, %v1527_v7 }
 0x417   :  { %v1470_v13 = vpop.f32.mrf.mxu0  ;;  %v1530_v14 = vpop.f32.mrf.mxu1 }
 0x418   :  { %v1061_v15 = vadd.f32 %v1469_v11, %v2137_v8  ;;  %v1141_v16 = vadd.f32 %v1529_v12, %v2137_v8 }
 0x419   :  { %v1471_v18 = vpop.f32.mrf.mxu0  ;;  %v1531_v19 = vpop.f32.mrf.mxu1 }
 0x41a   :  { %1187 = vst [vmem:[%s2273_s6] sm:$0xff] %v1061_v15  ;;  %v1472_v20 = vadd.f32 %v1471_v18, %v1470_v13  ;;  %1207 = vst [vmem:[%s2273_s6 + $0xa0] sm:$0xff] %v1141_v16  ;;  %v1532_v21 = vadd.f32 %v1531_v19, %v1530_v14 }
 0x41b   :  { %v1473_v22 = vpop.f32.mrf.mxu0  ;;  %v1533_v23 = vpop.f32.mrf.mxu1 }
 0x41c   :  { %v1064_v25 = vadd.f32 %v1472_v20, %v2137_v8  ;;  %v1144_v29 = vadd.f32 %v1532_v21, %v2137_v8 }
 0x41d   :  { %v1474_v30 = vpop.f32.mrf.mxu0  ;;  %v1534_v33 = vpop.f32.mrf.mxu1 }
 0x41e   :  { %1188 = vst [vmem:[%s2273_s6 + $0x8] sm:$0xff] %v1064_v25  ;;  %v1475_v34 = vadd.f32 %v1474_v30, %v1473_v22  ;;  %1208 = vst [vmem:[%s2273_s6 + $0xa8] sm:$0xff] %v1144_v29  ;;  %v1535_v35 = vadd.f32 %v1534_v33, %v1533_v23 }
 0x41f   :  { %v1476_v36 = vpop.f32.mrf.mxu0  ;;  %v1536_v37 = vpop.f32.mrf.mxu1 }
 0x420   :  { %v1069_v38 = vadd.f32 %v1475_v34, %v2137_v8  ;;  %v1149_v39 = vadd.f32 %v1535_v35, %v2137_v8 }
 0x421   :  { %v1477_v40 = vpop.f32.mrf.mxu0  ;;  %v1537_v41 = vpop.f32.mrf.mxu1 }
 0x422   :  { %1189 = vst [vmem:[%s2273_s6 + $0x10] sm:$0xff] %v1069_v38  ;;  %v1478_v62 = vadd.f32 %v1477_v40, %v1476_v36  ;;  %1209 = vst [vmem:[%s2273_s6 + $0xb0] sm:$0xff] %v1149_v39  ;;  %v1538_v0 = vadd.f32 %v1537_v41, %v1536_v37 }
 0x423   :  { %v1479_v6 = vpop.f32.mrf.mxu0  ;;  %v1539_v45 = vpop.f32.mrf.mxu1 }
 0x424   :  { %v1072_v27 = vadd.f32 %v1478_v62, %v2137_v8  ;;  %v1152_v28 = vadd.f32 %v1538_v0, %v2137_v8 }
 0x425   :  { %v1480_v31 = vpop.f32.mrf.mxu0  ;;  %v1540_v43 = vpop.f32.mrf.mxu1 }
 0x426   :  { %1190 = vst [vmem:[%s2273_s6 + $0x18] sm:$0xff] %v1072_v27  ;;  %v1481_v44 = vadd.f32 %v1480_v31, %v1479_v6  ;;  %1210 = vst [vmem:[%s2273_s6 + $0xb8] sm:$0xff] %v1152_v28  ;;  %v1541_v46 = vadd.f32 %v1540_v43, %v1539_v45 }
 0x427   :  { %v1482_v47 = vpop.f32.mrf.mxu0  ;;  %v1542_v48 = vpop.f32.mrf.mxu1 }
 0x428   :  { %v1077_v49 = vadd.f32 %v1481_v44, %v2137_v8  ;;  %v1157_v50 = vadd.f32 %v1541_v46, %v2137_v8 }
 0x429   :  { %v1483_v51 = vpop.f32.mrf.mxu0  ;;  %v1543_v52 = vpop.f32.mrf.mxu1 }
 0x42a   :  { %1191 = vst [vmem:[%s2273_s6 + $0x20] sm:$0xff] %v1077_v49  ;;  %v1484_v53 = vadd.f32 %v1483_v51, %v1482_v47  ;;  %1211 = vst [vmem:[%s2273_s6 + $0xc0] sm:$0xff] %v1157_v50  ;;  %v1544_v54 = vadd.f32 %v1543_v52, %v1542_v48 }
 0x42b   :  { %v1485_v55 = vpop.f32.mrf.mxu0  ;;  %v1545_v56 = vpop.f32.mrf.mxu1 }
 0x42c   :  { %v1080_v58 = vadd.f32 %v1484_v53, %v2137_v8  ;;  %v1160_v59 = vadd.f32 %v1544_v54, %v2137_v8 }
 0x42d   :  { %v1486_v60 = vpop.f32.mrf.mxu0  ;;  %v1546_v61 = vpop.f32.mrf.mxu1 }
 0x42e   :  { %1192 = vst [vmem:[%s2273_s6 + $0x28] sm:$0xff] %v1080_v58  ;;  %v1487_v63 = vadd.f32 %v1486_v60, %v1485_v55  ;;  %1212 = vst [vmem:[%s2273_s6 + $0xc8] sm:$0xff] %v1160_v59  ;;  %v1547_v1 = vadd.f32 %v1546_v61, %v1545_v56 }
 0x42f   :  { %v1488_v2 = vpop.f32.mrf.mxu0  ;;  %v1548_v4 = vpop.f32.mrf.mxu1 }
 0x430   :  { %v1085_v24 = vadd.f32 %v1487_v63, %v2137_v8  ;;  %v1165_v32 = vadd.f32 %v1547_v1, %v2137_v8 }
 0x431   :  { %v1489_v42 = vpop.f32.mrf.mxu0  ;;  %v1549_v57 = vpop.f32.mrf.mxu1 }
 0x432   :  { %1193 = vst [vmem:[%s2273_s6 + $0x30] sm:$0xff] %v1085_v24  ;;  %v1490_v17 = vadd.f32 %v1489_v42, %v1488_v2  ;;  %1213 = vst [vmem:[%s2273_s6 + $0xd0] sm:$0xff] %v1165_v32  ;;  %v1550_v26 = vadd.f32 %v1549_v57, %v1548_v4 }
 0x433   :  { %v1491_v3 = vpop.f32.mrf.mxu0  ;;  %v1551_v5 = vpop.f32.mrf.mxu1 }
 0x434   :  { %v1088_v7 = vadd.f32 %v1490_v17, %v2137_v8  ;;  %v1168_v9 = vadd.f32 %v1550_v26, %v2137_v8 }
 0x435   :  { %v1492_v10 = vpop.f32.mrf.mxu0  ;;  %v1552_v11 = vpop.f32.mrf.mxu1 }
 0x436   :  { %1194 = vst [vmem:[%s2273_s6 + $0x38] sm:$0xff] %v1088_v7  ;;  %v1493_v12 = vadd.f32 %v1492_v10, %v1491_v3  ;;  %1214 = vst [vmem:[%s2273_s6 + $0xd8] sm:$0xff] %v1168_v9  ;;  %v1553_v13 = vadd.f32 %v1552_v11, %v1551_v5 }
 0x437   :  { %v1494_v14 = vpop.f32.mrf.mxu0  ;;  %v1554_v15 = vpop.f32.mrf.mxu1 }
 0x438   :  { %v1093_v16 = vadd.f32 %v1493_v12, %v2137_v8  ;;  %v1173_v18 = vadd.f32 %v1553_v13, %v2137_v8 }
 0x439   :  { %v1495_v19 = vpop.f32.mrf.mxu0  ;;  %v1555_v20 = vpop.f32.mrf.mxu1 }
 0x43a   :  { %1195 = vst [vmem:[%s2273_s6 + $0x40] sm:$0xff] %v1093_v16  ;;  %v1496_v21 = vadd.f32 %v1495_v19, %v1494_v14  ;;  %1215 = vst [vmem:[%s2273_s6 + $0xe0] sm:$0xff] %v1173_v18  ;;  %v1556_v22 = vadd.f32 %v1555_v20, %v1554_v15 }
 0x43b   :  { %v1497_v23 = vpop.f32.mrf.mxu0  ;;  %v1557_v25 = vpop.f32.mrf.mxu1 }
 0x43c   :  { %v1096_v29 = vadd.f32 %v1496_v21, %v2137_v8  ;;  %v1176_v30 = vadd.f32 %v1556_v22, %v2137_v8 }
 0x43d   :  { %v1498_v33 = vpop.f32.mrf.mxu0  ;;  %v1558_v34 = vpop.f32.mrf.mxu1 }
 0x43e   :  { %1196 = vst [vmem:[%s2273_s6 + $0x48] sm:$0xff] %v1096_v29  ;;  %v1499_v35 = vadd.f32 %v1498_v33, %v1497_v23  ;;  %1216 = vst [vmem:[%s2273_s6 + $0xe8] sm:$0xff] %v1176_v30  ;;  %v1559_v36 = vadd.f32 %v1558_v34, %v1557_v25 }
 0x43f   :  { %v1500_v37 = vpop.f32.mrf.mxu0  ;;  %v1560_v38 = vpop.f32.mrf.mxu1 }
 0x440   :  { %v1101_v39 = vadd.f32 %v1499_v35, %v2137_v8  ;;  %v1181_v40 = vadd.f32 %v1559_v36, %v2137_v8 }
 0x441   :  { %v1501_v41 = vpop.f32.mrf.mxu0  ;;  %v1561_v62 = vpop.f32.mrf.mxu1 }
 0x442   :  { %1197 = vst [vmem:[%s2273_s6 + $0x50] sm:$0xff] %v1101_v39  ;;  %v1502_v0 = vadd.f32 %v1501_v41, %v1500_v37  ;;  %1217 = vst [vmem:[%s2273_s6 + $0xf0] sm:$0xff] %v1181_v40  ;;  %v1562_v6 = vadd.f32 %v1561_v62, %v1560_v38 }
 0x443   :  { %v1503_v45 = vpop.f32.mrf.mxu0 }
 0x444   :  { %v1104_v27 = vadd.f32 %v1502_v0, %v2137_v8  ;;  %v1184_v28 = vadd.f32 %v1562_v6, %v2137_v8 }
 0x445   :  { %v1504_v31 = vpop.f32.mrf.mxu0 }
 0x446   :  { %1198 = vst [vmem:[%s2273_s6 + $0x58] sm:$0xff] %v1104_v27  ;;  %v1505_v43 = vadd.f32 %v1504_v31, %v1503_v45  ;;  %1218 = vst [vmem:[%s2273_s6 + $0xf8] sm:$0xff] %v1184_v28 }
 0x447   :  { %v1506_v44 = vpop.f32.mrf.mxu0 }
 0x448   :  { %v1109_v46 = vadd.f32 %v1505_v43, %v2137_v8 }
 0x449   :  { %v1507_v47 = vpop.f32.mrf.mxu0 }
 0x44a   :  { %1199 = vst [vmem:[%s2273_s6 + $0x60] sm:$0xff] %v1109_v46  ;;  %v1508_v48 = vadd.f32 %v1507_v47, %v1506_v44 }
 0x44b   :  { %v1509_v49 = vpop.f32.mrf.mxu0 }
 0x44c   :  { %v1112_v50 = vadd.f32 %v1508_v48, %v2137_v8 }
 0x44d   :  { %v1510_v51 = vpop.f32.mrf.mxu0 }
 0x44e   :  { %1200 = vst [vmem:[%s2273_s6 + $0x68] sm:$0xff] %v1112_v50  ;;  %v1511_v52 = vadd.f32 %v1510_v51, %v1509_v49 }
 0x44f   :  { %v1512_v53 = vpop.f32.mrf.mxu0 }
 0x450   :  { %v1117_v54 = vadd.f32 %v1511_v52, %v2137_v8 }
 0x451   :  { %v1513_v55 = vpop.f32.mrf.mxu0 }
 0x452   :  { %1201 = vst [vmem:[%s2273_s6 + $0x70] sm:$0xff] %v1117_v54  ;;  %v1514_v56 = vadd.f32 %v1513_v55, %v1512_v53 }
 0x453   :  { %v1515_v58 = vpop.f32.mrf.mxu0 }
 0x454   :  { %v1120_v59 = vadd.f32 %v1514_v56, %v2137_v8 }
 0x455   :  { %v1516_v60 = vpop.f32.mrf.mxu0 }
 0x456   :  { %1202 = vst [vmem:[%s2273_s6 + $0x78] sm:$0xff] %v1120_v59  ;;  %v1517_v61 = vadd.f32 %v1516_v60, %v1515_v58 }
 0x457   :  { %v1518_v63 = vpop.f32.mrf.mxu0 }
 0x458   :  { %v1125_v1 = vadd.f32 %v1517_v61, %v2137_v8 }
 0x459   :  { %v1519_v2 = vpop.f32.mrf.mxu0 }
 0x45a   :  { %1203 = vst [vmem:[%s2273_s6 + $0x80] sm:$0xff] %v1125_v1  ;;  %v1520_v4 = vadd.f32 %v1519_v2, %v1518_v63 }
 0x45b   :  { %v1521_v24 = vpop.f32.mrf.mxu0 }
 0x45c   :  { %v1128_v32 = vadd.f32 %v1520_v4, %v2137_v8 }
 0x45d   :  { %v1522_v42 = vpop.f32.mrf.mxu0 }
 0x45e   :  { %1204 = vst [vmem:[%s2273_s6 + $0x88] sm:$0xff] %v1128_v32  ;;  %v1523_v57 = vadd.f32 %v1522_v42, %v1521_v24 }
 0x45f   :  { %v1524_v17 = vpop.f32.mrf.mxu0 }
 0x460   :  { %v1133_v26 = vadd.f32 %v1523_v57, %v2137_v8 }
 0x461   :  { %v1525_v3 = vpop.f32.mrf.mxu0 }
 0x462   :  { %1205 = vst [vmem:[%s2273_s6 + $0x90] sm:$0xff] %v1133_v26  ;;  %v1526_v5 = vadd.f32 %v1525_v3, %v1524_v17 }
 0x464   :  { %v1136_v7 = vadd.f32 %v1526_v5, %v2137_v8 }
 0x466   :  { %1206 = vst [vmem:[%s2273_s6 + $0x98] sm:$0xff] %v1136_v7 }

</bundles_post_ra>
